<compile_context>
chip_gen: v7x
topology: tpu7x:2x2x1
jax: 0.10.0
libtpu: 0.0.40
codegen_flags: <defaults>
</compile_context>

<pallas_src>
import jax
import jax.numpy as jnp
from jax import lax
from jax.experimental import pallas as pl
from jax.experimental.pallas import tpu as pltpu


_TARGET_BLOCK_BYTES = 8 * 1024 * 1024   # ~8 MiB input block -> near HBM roofline


def _choose_b_block(B):
    """Modest B tile (8..32), multiple of 8, with >=2 tiles along B when B allows."""
    if B <= 8:
        return B
    half = ((B // 2) // 8) * 8
    if half >= 8:
        return min(32, half)
    return 8


def _choose_s_block(S, b_block, H, x_itemsize):
    """Grow the S tile first; dtype-aware sublane quantum; ~8 MiB per block."""
    quantum = max(8, 32 // x_itemsize)          # f32: 8, bf16: 16, int8/fp8: 32
    per_row = max(1, b_block * H * x_itemsize)  # bytes per unit of S
    cap = _TARGET_BLOCK_BYTES // per_row
    if cap >= S:
        return S                                # whole sequence in one block
    s_blk = (cap // quantum) * quantum
    if s_blk < quantum:
        s_blk = quantum                         # at least one native tile
    return min(s_blk, S)


def _vmem_capacity_bytes():
    try:
        info = pltpu.get_tpu_info()
        cap = getattr(info, "vmem_capacity_bytes", None)
        if cap:
            return int(cap)
    except Exception:
        pass
    return 64 << 20   # conservative (v7x-sized) fallback


def _make_kernel(seq_len, s_block, mask_s):
    inv_s = float(1.0 / seq_len)

    def kernel(x_ref, w1_ref, b1_ref, w2_ref, b2_ref, o_ref, acc_ref):
        # x_ref:  (B_t, S_t, H)   w1_ref: (H, D)    b1_ref: (1, D)
        # w2_ref: (1, D)          b2_ref: (1, 1)    o_ref:  (B_t, 128)
        # acc_ref: (B_t, H) f32 scratch (sequence-sum accumulator)
        s = pl.program_id(1)

        @pl.when(s == 0)
        def _init():
            acc_ref[...] = jnp.zeros_like(acc_ref)

        x = x_ref[...].astype(jnp.float32)
        if mask_s:
            # Zero out rows of a partial (tail) S tile before accumulating.
            s_ids = lax.broadcasted_iota(jnp.int32, (s_block, x.shape[-1]), 0)
            s_ids = s_ids + s * s_block
            x = jnp.where((s_ids < seq_len)[None], x, 0.0)
        acc_ref[...] += jnp.sum(x, axis=1)

        @pl.when(s == pl.num_programs(1) - 1)
        def _finalize():
            # Single divide-by-S on the completed sum (correct for tiled S).
            pooled = acc_ref[...] * jnp.float32(inv_s)               # (B_t, H)

            # Linear(H -> 512) on the MXU; bf16 operands OK, f32 accumulate.
            h = jnp.dot(pooled.astype(w1_ref.dtype), w1_ref[...],
                        preferred_element_type=jnp.float32)
            h = jnp.tanh(h + b1_ref[...].astype(jnp.float32))        # (B_t, D)

            # Linear(512 -> 1) as VPU multiply + lane reduction.
            out = jnp.sum(h * w2_ref[...].astype(jnp.float32),
                          axis=-1, keepdims=True)                    # (B_t, 1)
            out = out + b2_ref[...].astype(jnp.float32)

            # Lane-dense store: broadcast the per-row scalar across 128 lanes.
            o_ref[...] = jnp.broadcast_to(out, o_ref.shape).astype(o_ref.dtype)

    return kernel


def value_network_forward(encoder_hidden, w1, b1, w2, b2, *,
                          b_block=None, s_block=None,
                          cast_weights_to_bf16=True):
    """Pallas implementation of ValueNetwork.forward.

    encoder_hidden: (B, S, H) float32 or bfloat16
    w1: (H, 512)  b1: (512,)  w2: (512, 1)  b2: (1,)  (in, out) layout
    cast_weights_to_bf16: halve W1 HBM/VMEM traffic (f32 accumulation kept);
      trades <~0.1% relative error. Set False for bit-accurate f32 math.
    returns: (B,) float32
    """
    B, S, H = encoder_hidden.shape
    H_w, D = w1.shape
    assert H_w == H

    if cast_weights_to_bf16 and w1.dtype == jnp.float32:
        w1 = w1.astype(jnp.bfloat16)

    x_itemsize = jnp.dtype(encoder_hidden.dtype).itemsize
    w_itemsize = jnp.dtype(w1.dtype).itemsize

    # --- tile selection (grow s_block first; modest b_block; >=2 B tiles) ---
    if b_block is None:
        b_block = _choose_b_block(B)
    if s_block is None:
        s_block = _choose_s_block(S, b_block, H, x_itemsize)
    assert b_block == B or b_block % 8 == 0, "b_block must be full B or 8-aligned"
    assert s_block == S or s_block % 8 == 0, "s_block must be full S or 8-aligned"

    grid = (pl.cdiv(B, b_block), pl.cdiv(S, s_block))
    mask_s = (S % s_block) != 0

    # --- reshape small params to 2-D / lane-friendly layouts ---------------
    b1_2d = b1.reshape(1, D)
    w2_row = w2.reshape(1, D)      # (512, 1) -> (1, 512): lane-dense weight row
    b2_2d = b2.reshape(1, 1)

    # --- VMEM budget (generation-aware) / cost hints ------------------------
    est_bytes = (
        2 * (b_block * s_block * H * x_itemsize)        # double-buffered input
        + 2 * (H * D * w_itemsize)                      # W1 (worst case 2 bufs)
        + 2 * (2 * D + 1) * 4                           # biases + w2 row
        + 2 * (b_block * 128 * 4)                       # output block
        + b_block * max(H, 128) * 4                     # f32 accumulator scratch
    )
    vmem_cap = _vmem_capacity_bytes()
    vmem_limit = int(min(max(est_bytes + (4 << 20), 32 << 20), (vmem_cap * 3) // 4))
    vmem_limit = int(min(max(vmem_limit, est_bytes + (2 << 20)), vmem_cap))

    cost = pl.CostEstimate(
        flops=2 * B * S * H + 2 * B * H * D + 2 * B * D,
        transcendentals=B * D,
        bytes_accessed=(B * S * H * x_itemsize
                        + H * D * w_itemsize
                        + (2 * D + 1) * 4
                        + B * 128 * 4),
    )

    kernel = _make_kernel(S, s_block, mask_s)
    out_shape = jax.ShapeDtypeStruct((B, 128), jnp.float32)

    def run(weight_mode):
        kw = {} if weight_mode is None else {"pipeline_mode": weight_mode}
        in_specs = [
            pl.BlockSpec((b_block, s_block, H), lambda b, s: (b, s, 0)),
            pl.BlockSpec((H, D), lambda b, s: (0, 0), **kw),
            pl.BlockSpec((1, D), lambda b, s: (0, 0), **kw),
            pl.BlockSpec((1, D), lambda b, s: (0, 0), **kw),
            pl.BlockSpec((1, 1), lambda b, s: (0, 0), **kw),
        ]
        return pl.pallas_call(
            kernel,
            out_shape=out_shape,
            grid_spec=pltpu.PrefetchScalarGridSpec(
                num_scalar_prefetch=0,
                grid=grid,
                in_specs=in_specs,
                out_specs=pl.BlockSpec((b_block, 128), lambda b, s: (b, 0)),
                scratch_shapes=[pltpu.VMEM((b_block, H), jnp.float32)],
            ),
            compiler_params=pltpu.CompilerParams(
                dimension_semantics=("parallel", "arbitrary"),
                vmem_limit_bytes=vmem_limit,
            ),
            cost_estimate=cost,
        )(encoder_hidden, w1, b1_2d, w2_row, b2_2d)

    # Weights never change across the grid: single-buffer them (frees VMEM for
    # bigger x blocks). Fall back to default buffering if unsupported.
    try:
        out_padded = run(pl.Buffered(1))
    except Exception:
        out_padded = run(None)

    # Lane-dense (B, 128) block -> (B,)  (the .squeeze(-1) of the PyTorch module)
    return out_padded[:, 0]


def init_params(key, hidden_size, inner=512):
    """Deterministic init mimicking torch.nn.Linear default (uniform +-1/sqrt(fan_in))."""
    k1, k2, k3, k4 = jax.random.split(key, 4)
    lim1 = 1.0 / jnp.sqrt(jnp.float32(hidden_size))
    lim2 = 1.0 / jnp.sqrt(jnp.float32(inner))
    # Stored as (in_features, out_features) — transposed vs torch's (out, in).
    w1 = jax.random.uniform(k1, (hidden_size, inner), jnp.float32, -lim1, lim1)
    b1 = jax.random.uniform(k2, (inner,), jnp.float32, -lim1, lim1)
    w2 = jax.random.uniform(k3, (inner, 1), jnp.float32, -lim2, lim2)
    b2 = jax.random.uniform(k4, (1,), jnp.float32, -lim2, lim2)
    return w1, b1, w2, b2


def _reference(encoder_hidden, w1, b1, w2, b2):
    pooled = encoder_hidden.astype(jnp.float32).mean(axis=1)
    return (jnp.tanh(pooled @ w1.astype(jnp.float32) + b1) @ w2 + b2)[:, 0]


if __name__ == "__main__":
    key = jax.random.PRNGKey(0)

    # --- Test 1: small shapes, bf16 activations, default settings (bf16 W1) ---
    B, S, H = 2, 8, 32
    k_x, k_p, key = jax.random.split(key, 3)
    x1 = jax.random.normal(k_x, (B, S, H), jnp.float32).astype(jnp.bfloat16)
    w1, b1, w2, b2 = init_params(k_p, H)

    out1 = jax.block_until_ready(value_network_forward(x1, w1, b1, w2, b2))
    ref1 = _reference(x1, w1, b1, w2, b2)
    assert out1.shape == (B,)
    assert jnp.allclose(out1, ref1, atol=2e-2, rtol=2e-2)

    # --- Test 2: multi-tile grid (2 B-tiles x 4 S-tiles), exact f32 path -----
    B2, S2, H2 = 16, 32, 128
    k_x2, k_p2, key = jax.random.split(key, 3)
    x2 = jax.random.normal(k_x2, (B2, S2, H2), jnp.float32)
    w1b, b1b, w2b, b2b = init_params(k_p2, H2)

    out2 = jax.block_until_ready(
        value_network_forward(x2, w1b, b1b, w2b, b2b,
                              b_block=8, s_block=8, cast_weights_to_bf16=False))
    ref2 = _reference(x2, w1b, b1b, w2b, b2b)
    assert out2.shape == (B2,)
    assert jnp.allclose(out2, ref2, atol=1e-4, rtol=1e-4)

    # --- Test 3: ragged S (20 rows, 8-row tiles -> masked tail), exact f32 ---
    B3, S3, H3 = 5, 20, 32
    k_x3, k_p3, key = jax.random.split(key, 3)
    x3 = jax.random.normal(k_x3, (B3, S3, H3), jnp.float32)
    w1c, b1c, w2c, b2c = init_params(k_p3, H3)

    out3 = jax.block_until_ready(
        value_network_forward(x3, w1c, b1c, w2c, b2c,
                              s_block=8, cast_weights_to_bf16=False))
    ref3 = _reference(x3, w1c, b1c, w2c, b2c)
    assert out3.shape == (B3,)
    assert jnp.allclose(out3, ref3, atol=1e-4, rtol=1e-4)

    print("KERNEL_OK")
</pallas_src>

<mosaic_0001>
module attributes {stable_mosaic.version = 11 : i64} {
  func.func @kernel(%arg0: i32, %arg1: i32, %arg2: memref<2x8x32xbf16, #tpu.memory_space<vmem>>, %arg3: memref<32x512xbf16, #tpu.memory_space<vmem>>, %arg4: memref<1x512xf32, #tpu.memory_space<vmem>>, %arg5: memref<1x512xf32, #tpu.memory_space<vmem>>, %arg6: memref<1x1xf32, #tpu.memory_space<vmem>>, %arg7: memref<2x128xf32, #tpu.memory_space<vmem>>, %arg8: memref<2x32xf32, #tpu.memory_space<vmem>>) attributes {dimension_semantics = [#tpu.dimension_semantics<parallel>, #tpu.dimension_semantics<arbitrary>], iteration_bounds = array<i64: 1, 1>, scalar_prefetch = 0 : i64, scratch_operands = 1 : i64, tpu.core_type = #tpu.core_type<tc>, window_params = [{transform_indices = @transform_0, window_bounds = array<i64: 2, 8, 32>}, {pipeline_mode = #tpu.pipeline_mode<synchronous>, transform_indices = @transform_1, window_bounds = array<i64: 32, 512>}, {pipeline_mode = #tpu.pipeline_mode<synchronous>, transform_indices = @transform_2, window_bounds = array<i64: 1, 512>}, {pipeline_mode = #tpu.pipeline_mode<synchronous>, transform_indices = @transform_3, window_bounds = array<i64: 1, 512>}, {pipeline_mode = #tpu.pipeline_mode<synchronous>, transform_indices = @transform_4, window_bounds = array<i64: 1, 1>}, {transform_indices = @transform_5, window_bounds = array<i64: 2, 128>}]} {
    %c0_i32 = arith.constant 0 : i32
    %0 = arith.cmpi eq, %arg1, %c0_i32 : i32
    %1 = arith.extui %0 : i1 to i32
    %c0_i32_0 = arith.constant 0 : i32
    %2 = arith.cmpi ne, %1, %c0_i32_0 : i32
    scf.if %2 {
      %cst_9 = arith.constant 0.000000e+00 : f32
      %12 = vector.broadcast %cst_9 : f32 to vector<2x32xf32>
      %c0_10 = arith.constant 0 : index
      %c0_11 = arith.constant 0 : index
      %13 = vector.load %arg8[%c0_10, %c0_11] : memref<2x32xf32, #tpu.memory_space<vmem>>, vector<2x32xf32>
      tpu.vector_store %arg8[%c0_10, %c0_11], %12 {strides = array<i32>} : memref<2x32xf32, #tpu.memory_space<vmem>>, vector<2x32xf32>,
    } else {
    }
    %c0 = arith.constant 0 : index
    %c0_1 = arith.constant 0 : index
    %c0_2 = arith.constant 0 : index
    %3 = vector.load %arg2[%c0, %c0_1, %c0_2] : memref<2x8x32xbf16, #tpu.memory_space<vmem>>, vector<2x8x32xbf16>
    %4 = arith.extf %3 : vector<2x8x32xbf16> to vector<2x8x32xf32>
    %c0_3 = arith.constant 0 : index
    %c0_4 = arith.constant 0 : index
    %5 = vector.load %arg8[%c0_3, %c0_4] : memref<2x32xf32, #tpu.memory_space<vmem>>, vector<2x32xf32>
    %cst = arith.constant dense<0.000000e+00> : vector<2x32xf32>
    %6 = vector.multi_reduction <add>, %4, %cst [1] : vector<2x8x32xf32> to vector<2x32xf32>
    %7 = arith.addf %5, %6 : vector<2x32xf32>
    %c0_5 = arith.constant 0 : index
    %c0_6 = arith.constant 0 : index
    %8 = vector.load %arg8[%c0_5, %c0_6] : memref<2x32xf32, #tpu.memory_space<vmem>>, vector<2x32xf32>
    tpu.vector_store %arg8[%c0_5, %c0_6], %7 {strides = array<i32>} : memref<2x32xf32, #tpu.memory_space<vmem>>, vector<2x32xf32>,
    %c0_i32_7 = arith.constant 0 : i32
    %9 = arith.cmpi eq, %arg1, %c0_i32_7 : i32
    %10 = arith.extui %9 : i1 to i32
    %c0_i32_8 = arith.constant 0 : i32
    %11 = arith.cmpi ne, %10, %c0_i32_8 : i32
    scf.if %11 {
      %c0_9 = arith.constant 0 : index
      %c0_10 = arith.constant 0 : index
      %12 = vector.load %arg8[%c0_9, %c0_10] : memref<2x32xf32, #tpu.memory_space<vmem>>, vector<2x32xf32>
      %cst_11 = arith.constant 1.250000e-01 : f32
      %13 = vector.broadcast %cst_11 : f32 to vector<2x32xf32>
      %14 = arith.mulf %12, %13 : vector<2x32xf32>
      %15 = arith.truncf %14 : vector<2x32xf32> to vector<2x32xbf16>
      %c0_12 = arith.constant 0 : index
      %c0_13 = arith.constant 0 : index
      %16 = vector.load %arg3[%c0_12, %c0_13] : memref<32x512xbf16, #tpu.memory_space<vmem>>, vector<32x512xbf16>
      %cst_14 = arith.constant dense<0.000000e+00> : vector<2x512xf32>
      %17 = tpu.matmul %15, %16, %cst_14 {dimension_numbers = #tpu.dot_dimension_numbers<[1], [0], [0], [1], [0, 0, 1, 1], [], []>} : vector<2x32xbf16>, vector<32x512xbf16>, vector<2x512xf32> -> vector<2x512xf32>
      %c0_15 = arith.constant 0 : index
      %c0_16 = arith.constant 0 : index
      %18 = vector.load %arg4[%c0_15, %c0_16] : memref<1x512xf32, #tpu.memory_space<vmem>>, vector<1x512xf32>
      %19 = vector.broadcast %18 : vector<1x512xf32> to vector<2x512xf32>
      %20 = arith.addf %17, %19 : vector<2x512xf32>
      %21 = math.tanh %20 : vector<2x512xf32>
      %c0_17 = arith.constant 0 : index
      %c0_18 = arith.constant 0 : index
      %22 = vector.load %arg5[%c0_17, %c0_18] : memref<1x512xf32, #tpu.memory_space<vmem>>, vector<1x512xf32>
      %23 = vector.broadcast %22 : vector<1x512xf32> to vector<2x512xf32>
      %24 = arith.mulf %21, %23 : vector<2x512xf32>
      %cst_19 = arith.constant dense<0.000000e+00> : vector<2xf32>
      %25 = vector.multi_reduction <add>, %24, %cst_19 [1] : vector<2x512xf32> to vector<2xf32>
      %26 = vector.shape_cast %25 : vector<2xf32> to vector<2x1xf32>
      %c0_20 = arith.constant 0 : index
      %c0_21 = arith.constant 0 : index
      %27 = vector.load %arg6[%c0_20, %c0_21] : memref<1x1xf32, #tpu.memory_space<vmem>>, vector<1x1xf32>
      %28 = vector.broadcast %27 : vector<1x1xf32> to vector<2x1xf32>
      %29 = arith.addf %26, %28 : vector<2x1xf32>
      %30 = vector.shape_cast %29 : vector<2x1xf32> to vector<2x1xf32>
      %31 = vector.broadcast %30 : vector<2x1xf32> to vector<2x128xf32>
      %c0_22 = arith.constant 0 : index
      %c0_23 = arith.constant 0 : index
      %32 = vector.load %arg7[%c0_22, %c0_23] : memref<2x128xf32, #tpu.memory_space<vmem>>, vector<2x128xf32>
      tpu.vector_store %arg7[%c0_22, %c0_23], %31 {strides = array<i32>} : memref<2x128xf32, #tpu.memory_space<vmem>>, vector<2x128xf32>,
    } else {
    }
    return
  }
  func.func @transform_0(%arg0: i32, %arg1: i32) -> (i32, i32, i32) {
    %c0_i32 = arith.constant 0 : i32
    %c0_i32_0 = arith.constant 0 : i32
    return %arg0, %arg1, %c0_i32 : i32, i32, i32
  }
  func.func @transform_1(%arg0: i32, %arg1: i32) -> (i32, i32) {
    %c0_i32 = arith.constant 0 : i32
    %c0_i32_0 = arith.constant 0 : i32
    %c0_i32_1 = arith.constant 0 : i32
    return %c0_i32, %c0_i32_0 : i32, i32
  }
  func.func @transform_2(%arg0: i32, %arg1: i32) -> (i32, i32) {
    %c0_i32 = arith.constant 0 : i32
    %c0_i32_0 = arith.constant 0 : i32
    %c0_i32_1 = arith.constant 0 : i32
    return %c0_i32, %c0_i32_0 : i32, i32
  }
  func.func @transform_3(%arg0: i32, %arg1: i32) -> (i32, i32) {
    %c0_i32 = arith.constant 0 : i32
    %c0_i32_0 = arith.constant 0 : i32
    %c0_i32_1 = arith.constant 0 : i32
    return %c0_i32, %c0_i32_0 : i32, i32
  }
  func.func @transform_4(%arg0: i32, %arg1: i32) -> (i32, i32) {
    %c0_i32 = arith.constant 0 : i32
    %c0_i32_0 = arith.constant 0 : i32
    %c0_i32_1 = arith.constant 0 : i32
    return %c0_i32, %c0_i32_0 : i32, i32
  }
  func.func @transform_5(%arg0: i32, %arg1: i32) -> (i32, i32) {
    %c0_i32 = arith.constant 0 : i32
    %c0_i32_0 = arith.constant 0 : i32
    return %arg0, %c0_i32 : i32, i32
  }
}

module attributes {stable_mosaic.version = 11 : i64} {
  func.func @kernel(%arg0: i32, %arg1: i32, %arg2: memref<2x8x32xbf16, #tpu.memory_space<vmem>>, %arg3: memref<32x512xbf16, #tpu.memory_space<vmem>>, %arg4: memref<1x512xf32, #tpu.memory_space<vmem>>, %arg5: memref<1x512xf32, #tpu.memory_space<vmem>>, %arg6: memref<1x1xf32, #tpu.memory_space<vmem>>, %arg7: memref<2x128xf32, #tpu.memory_space<vmem>>, %arg8: memref<2x32xf32, #tpu.memory_space<vmem>>) attributes {dimension_semantics = [#tpu.dimension_semantics<parallel>, #tpu.dimension_semantics<arbitrary>], iteration_bounds = array<i64: 1, 1>, scalar_prefetch = 0 : i64, scratch_operands = 1 : i64, tpu.core_type = #tpu.core_type<tc>, window_params = [{transform_indices = @transform_0, window_bounds = array<i64: 2, 8, 32>}, {pipeline_mode = #tpu.pipeline_mode<synchronous>, transform_indices = @transform_1, window_bounds = array<i64: 32, 512>}, {pipeline_mode = #tpu.pipeline_mode<synchronous>, transform_indices = @transform_2, window_bounds = array<i64: 1, 512>}, {pipeline_mode = #tpu.pipeline_mode<synchronous>, transform_indices = @transform_3, window_bounds = array<i64: 1, 512>}, {pipeline_mode = #tpu.pipeline_mode<synchronous>, transform_indices = @transform_4, window_bounds = array<i64: 1, 1>}, {transform_indices = @transform_5, window_bounds = array<i64: 2, 128>}]} {
    %c0_i32 = arith.constant 0 : i32
    %0 = arith.cmpi eq, %arg1, %c0_i32 : i32
    %1 = arith.extui %0 : i1 to i32
    %c0_i32_0 = arith.constant 0 : i32
    %2 = arith.cmpi ne, %1, %c0_i32_0 : i32
    scf.if %2 {
      %cst_9 = arith.constant 0.000000e+00 : f32
      %12 = vector.broadcast %cst_9 : f32 to vector<2x32xf32>
      %c0_10 = arith.constant 0 : index
      %c0_11 = arith.constant 0 : index
      %13 = vector.load %arg8[%c0_10, %c0_11] : memref<2x32xf32, #tpu.memory_space<vmem>>, vector<2x32xf32>
      tpu.vector_store %arg8[%c0_10, %c0_11], %12 {strides = array<i32>} : memref<2x32xf32, #tpu.memory_space<vmem>>, vector<2x32xf32>,
    } else {
    }
    %c0 = arith.constant 0 : index
    %c0_1 = arith.constant 0 : index
    %c0_2 = arith.constant 0 : index
    %3 = vector.load %arg2[%c0, %c0_1, %c0_2] : memref<2x8x32xbf16, #tpu.memory_space<vmem>>, vector<2x8x32xbf16>
    %4 = arith.extf %3 : vector<2x8x32xbf16> to vector<2x8x32xf32>
    %c0_3 = arith.constant 0 : index
    %c0_4 = arith.constant 0 : index
    %5 = vector.load %arg8[%c0_3, %c0_4] : memref<2x32xf32, #tpu.memory_space<vmem>>, vector<2x32xf32>
    %cst = arith.constant dense<0.000000e+00> : vector<2x32xf32>
    %6 = vector.multi_reduction <add>, %4, %cst [1] : vector<2x8x32xf32> to vector<2x32xf32>
    %7 = arith.addf %5, %6 : vector<2x32xf32>
    %c0_5 = arith.constant 0 : index
    %c0_6 = arith.constant 0 : index
    %8 = vector.load %arg8[%c0_5, %c0_6] : memref<2x32xf32, #tpu.memory_space<vmem>>, vector<2x32xf32>
    tpu.vector_store %arg8[%c0_5, %c0_6], %7 {strides = array<i32>} : memref<2x32xf32, #tpu.memory_space<vmem>>, vector<2x32xf32>,
    %c0_i32_7 = arith.constant 0 : i32
    %9 = arith.cmpi eq, %arg1, %c0_i32_7 : i32
    %10 = arith.extui %9 : i1 to i32
    %c0_i32_8 = arith.constant 0 : i32
    %11 = arith.cmpi ne, %10, %c0_i32_8 : i32
    scf.if %11 {
      %c0_9 = arith.constant 0 : index
      %c0_10 = arith.constant 0 : index
      %12 = vector.load %arg8[%c0_9, %c0_10] : memref<2x32xf32, #tpu.memory_space<vmem>>, vector<2x32xf32>
      %cst_11 = arith.constant 1.250000e-01 : f32
      %13 = vector.broadcast %cst_11 : f32 to vector<2x32xf32>
      %14 = arith.mulf %12, %13 : vector<2x32xf32>
      %15 = arith.truncf %14 : vector<2x32xf32> to vector<2x32xbf16>
      %c0_12 = arith.constant 0 : index
      %c0_13 = arith.constant 0 : index
      %16 = vector.load %arg3[%c0_12, %c0_13] : memref<32x512xbf16, #tpu.memory_space<vmem>>, vector<32x512xbf16>
      %cst_14 = arith.constant dense<0.000000e+00> : vector<2x512xf32>
      %17 = tpu.matmul %15, %16, %cst_14 {dimension_numbers = #tpu.dot_dimension_numbers<[1], [0], [0], [1], [0, 0, 1, 1], [], []>} : vector<2x32xbf16>, vector<32x512xbf16>, vector<2x512xf32> -> vector<2x512xf32>
      %c0_15 = arith.constant 0 : index
      %c0_16 = arith.constant 0 : index
      %18 = vector.load %arg4[%c0_15, %c0_16] : memref<1x512xf32, #tpu.memory_space<vmem>>, vector<1x512xf32>
      %19 = vector.broadcast %18 : vector<1x512xf32> to vector<2x512xf32>
      %20 = arith.addf %17, %19 : vector<2x512xf32>
      %21 = math.tanh %20 : vector<2x512xf32>
      %c0_17 = arith.constant 0 : index
      %c0_18 = arith.constant 0 : index
      %22 = vector.load %arg5[%c0_17, %c0_18] : memref<1x512xf32, #tpu.memory_space<vmem>>, vector<1x512xf32>
      %23 = vector.broadcast %22 : vector<1x512xf32> to vector<2x512xf32>
      %24 = arith.mulf %21, %23 : vector<2x512xf32>
      %cst_19 = arith.constant dense<0.000000e+00> : vector<2xf32>
      %25 = vector.multi_reduction <add>, %24, %cst_19 [1] : vector<2x512xf32> to vector<2xf32>
      %26 = vector.shape_cast %25 : vector<2xf32> to vector<2x1xf32>
      %c0_20 = arith.constant 0 : index
      %c0_21 = arith.constant 0 : index
      %27 = vector.load %arg6[%c0_20, %c0_21] : memref<1x1xf32, #tpu.memory_space<vmem>>, vector<1x1xf32>
      %28 = vector.broadcast %27 : vector<1x1xf32> to vector<2x1xf32>
      %29 = arith.addf %26, %28 : vector<2x1xf32>
      %30 = vector.shape_cast %29 : vector<2x1xf32> to vector<2x1xf32>
      %31 = vector.broadcast %30 : vector<2x1xf32> to vector<2x128xf32>
      %c0_22 = arith.constant 0 : index
      %c0_23 = arith.constant 0 : index
      %32 = vector.load %arg7[%c0_22, %c0_23] : memref<2x128xf32, #tpu.memory_space<vmem>>, vector<2x128xf32>
      tpu.vector_store %arg7[%c0_22, %c0_23], %31 {strides = array<i32>} : memref<2x128xf32, #tpu.memory_space<vmem>>, vector<2x128xf32>,
    } else {
    }
    return
  }
  func.func @transform_0(%arg0: i32, %arg1: i32) -> (i32, i32, i32) {
    %c0_i32 = arith.constant 0 : i32
    %c0_i32_0 = arith.constant 0 : i32
    return %arg0, %arg1, %c0_i32 : i32, i32, i32
  }
  func.func @transform_1(%arg0: i32, %arg1: i32) -> (i32, i32) {
    %c0_i32 = arith.constant 0 : i32
    %c0_i32_0 = arith.constant 0 : i32
    %c0_i32_1 = arith.constant 0 : i32
    return %c0_i32, %c0_i32_0 : i32, i32
  }
  func.func @transform_2(%arg0: i32, %arg1: i32) -> (i32, i32) {
    %c0_i32 = arith.constant 0 : i32
    %c0_i32_0 = arith.constant 0 : i32
    %c0_i32_1 = arith.constant 0 : i32
    return %c0_i32, %c0_i32_0 : i32, i32
  }
  func.func @transform_3(%arg0: i32, %arg1: i32) -> (i32, i32) {
    %c0_i32 = arith.constant 0 : i32
    %c0_i32_0 = arith.constant 0 : i32
    %c0_i32_1 = arith.constant 0 : i32
    return %c0_i32, %c0_i32_0 : i32, i32
  }
  func.func @transform_4(%arg0: i32, %arg1: i32) -> (i32, i32) {
    %c0_i32 = arith.constant 0 : i32
    %c0_i32_0 = arith.constant 0 : i32
    %c0_i32_1 = arith.constant 0 : i32
    return %c0_i32, %c0_i32_0 : i32, i32
  }
  func.func @transform_5(%arg0: i32, %arg1: i32) -> (i32, i32) {
    %c0_i32 = arith.constant 0 : i32
    %c0_i32_0 = arith.constant 0 : i32
    return %arg0, %c0_i32 : i32, i32
  }
}

</mosaic_0001>

<bundles_post_ra>
// kernel: tpu_custom_call.1
= control target key start
LH: loop header
LB: loop body
LE: loop exit
PB: predicated region body
PF: predicated region fallthrough
CT: control target
= control target key end

     0   :  { %s524_s0 = inlined_call_operand.hbm [shape: bf16[2,8,32], index: 0, kind: input, shape index: {}]   ;;  %s525_s1 = inlined_call_operand.hbm [shape: bf16[32,512], index: 1, kind: input, shape index: {}]   ;;  %s526_s2 = inlined_call_operand.vmem [shape: f32[1,512], index: 2, kind: input, shape index: {}]   ;;  %s527_s3 = inlined_call_operand.vmem [shape: f32[1,512], index: 3, kind: input, shape index: {}]   ;;  %s528_s4 = inlined_call_operand.<no memory space> [shape: f32[1,1], index: 4, kind: input, shape index: {}]   ;;  %s529_s5 = inlined_call_operand.hbm [shape: f32[2,128], index: 5, kind: output, shape index: {}]  }
   0x1   :  { %v10_v0 = vstv %s528_s4 }
   0x2   :  { %11 = vst [vmem:[#allocation3] sm:$0x1] %v10_v0 }
   0x3   :  { %12 = vsyncpa [#allocation5], 0 }
   0x4   :  { %13 = vsyncpa [#allocation8], 0 }
   0x5   :  { %14 = vsyncpa [#allocation6], 0  ;;  %s434_s20 = smov [#allocation4]   ;;  %s362_s24 = scalar_lea.hbm %s524_s0, 128 }
   0x6   :  { %s20_s21 = sshll.u32 %s434_s20, 4  ;;  %p363_p0 = scmp.ne.s32.totalorder %s524_s0, %s362_s24  ;;  %s21_s21 = int_to_ptr.vmem [resolvable:$true] %s20_s21 }
   0x7   :  { %p366_p1 = scmp.lt.u32.totalorder %s362_s24, %s524_s0 }
   0x9   :  { %p368_p2 = pnand %p366_p1, %p363_p0 }
   0xb   :  { %371 = shalt.err (!%p368_p2)
}
   0xc   :  { %s372_s4 = scalar_lea.vmem %s21_s21, 128  ;;  %p377_p4 = scmp.lt.s32.totalorder %s21_s21, %s21_s21 }
   0xd   :  { %p373_p3 = scmp.ne.s32.totalorder %s21_s21, %s372_s4  ;;  %p378_p5 = scmp.lt.s32.totalorder %s372_s4, %s372_s4 }
   0xf   :  { %p379_p6 = por %p378_p5, %p377_p4 }
  0x11   :  { %p380_p7 = pnand %p379_p6, %p373_p3 }
  0x13   :  { %383 = shalt.err (!%p380_p7)
}
  0x14   :  { %s435_s29 = smov 64   ;;  %s436_s30 = smov 4  }
  0x15   :  { %26 = dma.hbm_to_vmem [thread:$0]  %s524_s0, 128, %s21_s21, [#allocation5], %s435_s29, %s435_s29, %s436_s30  }
  0x16   :  { %s437_s8 = smov [#allocation7]   ;;  %s384_s12 = scalar_lea.hbm %s525_s1, 1024 }
  0x17   :  { %s32_s9 = sshll.u32 %s437_s8, 4  ;;  %p385_p8 = scmp.ne.s32.totalorder %s525_s1, %s384_s12  ;;  %s33_s9 = int_to_ptr.vmem [resolvable:$true] %s32_s9 }
  0x18   :  { %p388_p9 = scmp.lt.u32.totalorder %s384_s12, %s525_s1 }
  0x1a   :  { %p390_p10 = pnand %p388_p9, %p385_p8 }
  0x1c   :  { %393 = shalt.err (!%p390_p10)
}
  0x1d   :  { %s394_s17 = scalar_lea.vmem %s33_s9, 1024  ;;  %p399_p12 = scmp.lt.s32.totalorder %s33_s9, %s33_s9 }
  0x1e   :  { %p395_p11 = scmp.ne.s32.totalorder %s33_s9, %s394_s17  ;;  %p400_p13 = scmp.lt.s32.totalorder %s394_s17, %s394_s17 }
  0x20   :  { %p401_p0 = por %p400_p13, %p399_p12 }
  0x22   :  { %p402_p1 = pnand %p401_p0, %p395_p11 }
  0x24   :  { %405 = shalt.err (!%p402_p1)
}
  0x25   :  { %s438_s0 = smov 256   ;;  %s439_s18 = smov 16  }
  0x26   :  { %38 = dma.hbm_to_vmem [thread:$0]  %s525_s1, 1024, %s33_s9, [#allocation8], %s438_s0, %s438_s0, %s439_s18  }
  0x27   :  { %428 = dma.done.wait [#allocation5], 128  }
  0x28   :  { %429 = vsyncadd [#allocation5], 4294967168 }
  0x29   :  { %430 = dma.done.wait [#allocation8], 1024  }
  0x2a   :  { %431 = vsyncadd [#allocation8], 4294966272  ;;  %vm56_vm0 = vcmask 254976   ;;  %v440_v1 = vmov 0   ;;  %v441_v2 = vmov 0.0   ;;  %v329_v11 = vld [vmem:[#allocation4] sm:$0xff]   ;;  %v102_v34 = vlaneseq }
  0x2b   :  { %197 = vmatprep.mubr.bf16.mxu0 %v440_v1  ;;  %238 = vmatprep.mubr.bf16.mxu1 %v440_v1  ;;  %57 = vst.msk [vmem:[#allocation2] sm:$0x3] %vm56_vm0, %v441_v2  ;;  %v342_v3 = vld [vmem:[#allocation7 + $0x4] ss:$16 sps:$4 sm:$0xff]   ;;  %v344_v4 = vld [vmem:[#allocation7 + $0xc] ss:$16 sps:$4 sm:$0xff]   ;;  %v330_v12 = vunpack.c.l.bf16 %v329_v11  ;;  %v331_v13 = vunpack.c.h.bf16 %v329_v11 }
  0x2c   :  { %341 = vset.pattern.permute.xlu0 %v440_v1  ;;  %165 = vmatprep.subr.bf16.mxu0 %v342_v3  ;;  %v346_v5 = vld [vmem:[#allocation7] ss:$16 sps:$4 sm:$0xff]   ;;  %v347_v6 = vld [vmem:[#allocation7 + $0x8] ss:$16 sps:$4 sm:$0xff]   ;;  %v348_v7 = vld [vmem:[#allocation7 + $0x24] ss:$16 sps:$4 sm:$0xff]  }
  0x2d   :  { %206 = vmatprep.subr.bf16.mxu1 %v344_v4  ;;  %166 = vmatpush1.bf16.msra.mxu0 %v346_v5  ;;  %v350_v8 = vld [vmem:[#allocation7 + $0x2c] ss:$16 sps:$4 sm:$0xff]   ;;  %v352_v9 = vld [vmem:[#allocation7 + $0x20] ss:$16 sps:$4 sm:$0xff]   ;;  %v353_v10 = vld [vmem:[#allocation7 + $0x28] ss:$16 sps:$4 sm:$0xff]  }
  0x2e   :  { %207 = vmatpush1.bf16.msra.mxu1 %v347_v6  ;;  %167 = vmatprep.subr.bf16.mxu0 %v348_v7  ;;  %vm63_vm1 = vcmask 261120   ;;  %vm80_vm2 = vcmask 1041409   ;;  %v103_v35 = vshrl.u32 %v102_v34, 7  ;;  %v100_v38 = vld [vmem:[%s526_s2] sm:$0xf]  ;;  %vm277_vm3 = vcmask 1041408  }
  0x2f   :  { %208 = vmatprep.subr.bf16.mxu1 %v350_v8  ;;  %v64_v14 = vsel %vm63_vm1, %v330_v12, 0.0  ;;  %v71_v15 = vsel %vm63_vm1, %v331_v13, 0.0  ;;  %v251_v57 = vld [vmem:[%s527_s3] sm:$0xf]  ;;  %s442_s3 = smov [#allocation9]  }
  0x30   :  { %v65_v16 = vrot.slane %v64_v14, 4  ;;  %v72_v17 = vrot.slane %v71_v15, 4  ;;  %v104_v36 = vsub.s32 0, %v103_v35  ;;  %v112_v37 = vsub.s32 2, %v103_v35  ;;  %v327_v13 = vld [vmem:[#allocation3] ss:$0 sm:$0xff] }
  0x31   :  { %168 = vmatpush1.bf16.msra.mxu0 %v352_v9  ;;  %v108_v39 = vsub.s32 1, %v103_v35  ;;  %v116_v40 = vsub.s32 3, %v103_v35  ;;  %s307_s23 = sshll.u32 %s442_s3, 4  ;;  %s308_s23 = int_to_ptr.vmem [resolvable:$true] %s307_s23 }
  0x32   :  { %209 = vmatpush1.bf16.msra.mxu1 %v353_v10  ;;  %v66_v18 = vadd.f32 %v65_v16, %v64_v14  ;;  %v73_v19 = vadd.f32 %v72_v17, %v71_v15  ;;  %v62_v26 = vld [vmem:[#allocation2] sm:$0x3]  ;;  %v105_v41 = vrot.slane %v100_v38, %v104_v36  ;;  %v113_v42 = vrot.slane %v100_v38, %v112_v37  ;;  %s406_s24 = scalar_lea.vmem %s308_s23, 32  ;;  %p411_p3 = scmp.lt.s32.totalorder %s308_s23, %s308_s23 }
  0x33   :  { %v109_v43 = vrot.slane %v100_v38, %v108_v39  ;;  %v117_v44 = vrot.slane %v100_v38, %v116_v40  ;;  %v256_v58 = vrot.slane %v251_v57, %v104_v36  ;;  %v264_v59 = vrot.slane %v251_v57, %v112_v37  ;;  %p407_p2 = scmp.ne.s32.totalorder %s308_s23, %s406_s24  ;;  %p412_p4 = scmp.lt.s32.totalorder %s406_s24, %s406_s24 }
  0x34   :  { %v67_v20 = vrot.slane %v66_v18, 2  ;;  %v74_v21 = vrot.slane %v73_v19, 2  ;;  %v260_v60 = vrot.slane %v251_v57, %v108_v39  ;;  %v268_v63 = vrot.slane %v251_v57, %v116_v40 }
  0x35   :  { %p413_p5 = por %p412_p4, %p411_p3 }
  0x36   :  { %v68_v22 = vadd.f32 %v67_v20, %v66_v18  ;;  %v75_v23 = vadd.f32 %v74_v21, %v73_v19 }
  0x37   :  { %p414_p6 = pnand %p413_p5, %p407_p2 }
  0x38   :  { %v69_v24 = vrot.slane %v68_v22, 1  ;;  %v76_v25 = vrot.slane %v75_v23, 1 }
  0x3a   :  { %v70_v27 = vadd.f32 %v69_v24, %v68_v22  ;;  %v77_v28 = vadd.f32 %v76_v25, %v75_v23 }
  0x3c   :  { %v81_v29 = vsel %vm80_vm2, %v77_v28, %v70_v27 }
  0x3d   :  { %v83_v30 = vadd.f32 %v81_v29, %v62_v26 }
  0x3f   :  { %85 = vst.msk [vmem:[#allocation2] sm:$0x3] %vm56_vm0, %v83_v30 }
  0x46   :  { %v89_v31 = vld [vmem:[#allocation2] sm:$0x3] }
  0x47   :  { %v90_v32 = vmul.f32 0.125, %v89_v31 }
  0x49   :  { %v91_v33 = vpack.c.bf16 %v90_v32, %v90_v32 }
  0x4b   :  { %325 = vmatmul.mubr.msk.bf16.vlgmr.msra.gmra.mrb[0].mxu0 %vm63_vm1, %v91_v33  ;;  %326 = vmatmul.mubr.msk.bf16.vlgmr.msra.gmra.mrb[0].mxu1 %vm63_vm1, %v91_v33 }
 0x11e   :  { %v199_v45 = vpop.f32.mrb[0].mxu0  ;;  %v240_v46 = vpop.f32.mrb[0].mxu1 }
 0x11f   :  { %v200_v47 = vadd.f32 %v199_v45, %v105_v41  ;;  %v241_v48 = vadd.f32 %v240_v46, %v113_v42  ;;  %v201_v49 = vpop.f32.mrb[1].mxu0  ;;  %v242_v50 = vpop.f32.mrb[1].mxu1 }
 0x120   :  { %v202_v51 = vadd.f32 %v201_v49, %v109_v43  ;;  %v243_v52 = vadd.f32 %v242_v50, %v117_v44  ;;  %v203_v53 = vpop.f32.mrb[2].mxu0  ;;  %v244_v54 = vpop.f32.mrb[2].mxu1 }
 0x121   :  { %354 = vtanh.f32 %v200_v47  ;;  %v204_v55 = vpop.f32.mrb[3].mxu0  ;;  %v245_v56 = vpop.f32.mrb[3].mxu1 }
 0x122   :  { %356 = vtanh.f32 %v241_v48 }
 0x123   :  { %358 = vtanh.f32 %v202_v51 }
 0x124   :  { %360 = vtanh.f32 %v243_v52 }
 0x12b   :  { %v355_v61 = vpop.eup %354 }
 0x12c   :  { %v357_v62 = vpop.eup %356  ;;  %v273_v0 = vmul.f32 %v355_v61, %v256_v58 }
 0x12d   :  { %v359_v1 = vpop.eup %358  ;;  %v275_v2 = vmul.f32 %v357_v62, %v264_v59 }
 0x12e   :  { %v361_v3 = vpop.eup %360  ;;  %v274_v4 = vmul.f32 %v359_v1, %v260_v60  ;;  %v278_v5 = vsel %vm277_vm3, %v273_v0, 0.0 }
 0x12f   :  { %v276_v6 = vmul.f32 %v361_v3, %v268_v63  ;;  %v281_v8 = vsel %vm277_vm3, %v275_v2, 0.0 }
 0x130   :  { %v279_v7 = vsel %vm277_vm3, %v274_v4, 0.0 }
 0x131   :  { %v280_v9 = vadd.f32 %v279_v7, %v278_v5  ;;  %v283_v11 = vsel %vm277_vm3, %v276_v6, 0.0 }
 0x133   :  { %v282_v10 = vadd.f32 %v281_v8, %v280_v9 }
 0x135   :  { %v284_v12 = vadd.f32 %v283_v11, %v282_v10 }
 0x137   :  { %285 = vadd.xlane.f32.xlu0 %v284_v12 }
 0x1c4   :  { %v286_v14 = vpop.xlane.xlu0 %285 }
 0x1c5   :  { %v294_v15 = vadd.f32 %v327_v13, %v286_v14 }
 0x1c7   :  { %297 = vperm.xlu0 %341, %v294_v15  }
 0x246   :  { %v298_v16 = vpop.permute.xlu0 %297 }
 0x247   :  { %300 = vst [vmem:[#allocation9] sm:$0x3] %v298_v16 }
 0x248   :  { %417 = shalt.err (!%p414_p6)
}
 0x249   :  { %s418_s27 = scalar_lea.hbm %s529_s5, 32 }
 0x24a   :  { %p419_p7 = scmp.ne.s32.totalorder %s529_s5, %s418_s27  ;;  %p422_p8 = scmp.lt.u32.totalorder %s418_s27, %s529_s5 }
 0x24c   :  { %p424_p9 = pnand %p422_p8, %p419_p7 }
 0x24e   :  { %427 = shalt.err (!%p424_p9)
}
 0x24f   :  { %310 = dma.vmem_to_hbm [thread:$0]  %s308_s23, 32, %s529_s5, [#allocation6]  }
 0x250   :  { %432 = dma.done.wait [#allocation6], 32  }
 0x251   :  { %433 = vsyncadd [#allocation6], 4294967264 }
 0x252   :  { %314 = vsyncpa [#allocation5], 1 }
 0x253   :  { %315 = vsyncpa [#allocation8], 1 }
 0x254   :  { %316 = vsyncpa [#allocation6], 1 }

// kernel: tpu_custom_call.1
= control target key start
LH: loop header
LB: loop body
LE: loop exit
PB: predicated region body
PF: predicated region fallthrough
CT: control target
= control target key end

     0   :  { %s524_s0 = inlined_call_operand.hbm [shape: bf16[2,8,32], index: 0, kind: input, shape index: {}]   ;;  %s525_s1 = inlined_call_operand.hbm [shape: bf16[32,512], index: 1, kind: input, shape index: {}]   ;;  %s526_s2 = inlined_call_operand.vmem [shape: f32[1,512], index: 2, kind: input, shape index: {}]   ;;  %s527_s3 = inlined_call_operand.vmem [shape: f32[1,512], index: 3, kind: input, shape index: {}]   ;;  %s528_s4 = inlined_call_operand.<no memory space> [shape: f32[1,1], index: 4, kind: input, shape index: {}]   ;;  %s529_s5 = inlined_call_operand.hbm [shape: f32[2,128], index: 5, kind: output, shape index: {}]  }
   0x1   :  { %v10_v0 = vstv %s528_s4 }
   0x2   :  { %11 = vst [vmem:[#allocation3] sm:$0x1] %v10_v0 }
   0x3   :  { %12 = vsyncpa [#allocation5], 0 }
   0x4   :  { %13 = vsyncpa [#allocation8], 0 }
   0x5   :  { %14 = vsyncpa [#allocation6], 0  ;;  %s434_s20 = smov [#allocation4]   ;;  %s362_s24 = scalar_lea.hbm %s524_s0, 128 }
   0x6   :  { %s20_s21 = sshll.u32 %s434_s20, 4  ;;  %p363_p0 = scmp.ne.s32.totalorder %s524_s0, %s362_s24  ;;  %s21_s21 = int_to_ptr.vmem [resolvable:$true] %s20_s21 }
   0x7   :  { %p366_p1 = scmp.lt.u32.totalorder %s362_s24, %s524_s0 }
   0x9   :  { %p368_p2 = pnand %p366_p1, %p363_p0 }
   0xb   :  { %371 = shalt.err (!%p368_p2)
}
   0xc   :  { %s372_s4 = scalar_lea.vmem %s21_s21, 128  ;;  %p377_p4 = scmp.lt.s32.totalorder %s21_s21, %s21_s21 }
   0xd   :  { %p373_p3 = scmp.ne.s32.totalorder %s21_s21, %s372_s4  ;;  %p378_p5 = scmp.lt.s32.totalorder %s372_s4, %s372_s4 }
   0xf   :  { %p379_p6 = por %p378_p5, %p377_p4 }
  0x11   :  { %p380_p7 = pnand %p379_p6, %p373_p3 }
  0x13   :  { %383 = shalt.err (!%p380_p7)
}
  0x14   :  { %s435_s29 = smov 64   ;;  %s436_s30 = smov 4  }
  0x15   :  { %26 = dma.hbm_to_vmem [thread:$0]  %s524_s0, 128, %s21_s21, [#allocation5], %s435_s29, %s435_s29, %s436_s30  }
  0x16   :  { %s437_s8 = smov [#allocation7]   ;;  %s384_s12 = scalar_lea.hbm %s525_s1, 1024 }
  0x17   :  { %s32_s9 = sshll.u32 %s437_s8, 4  ;;  %p385_p8 = scmp.ne.s32.totalorder %s525_s1, %s384_s12  ;;  %s33_s9 = int_to_ptr.vmem [resolvable:$true] %s32_s9 }
  0x18   :  { %p388_p9 = scmp.lt.u32.totalorder %s384_s12, %s525_s1 }
  0x1a   :  { %p390_p10 = pnand %p388_p9, %p385_p8 }
  0x1c   :  { %393 = shalt.err (!%p390_p10)
}
  0x1d   :  { %s394_s17 = scalar_lea.vmem %s33_s9, 1024  ;;  %p399_p12 = scmp.lt.s32.totalorder %s33_s9, %s33_s9 }
  0x1e   :  { %p395_p11 = scmp.ne.s32.totalorder %s33_s9, %s394_s17  ;;  %p400_p13 = scmp.lt.s32.totalorder %s394_s17, %s394_s17 }
  0x20   :  { %p401_p0 = por %p400_p13, %p399_p12 }
  0x22   :  { %p402_p1 = pnand %p401_p0, %p395_p11 }
  0x24   :  { %405 = shalt.err (!%p402_p1)
}
  0x25   :  { %s438_s0 = smov 256   ;;  %s439_s18 = smov 16  }
  0x26   :  { %38 = dma.hbm_to_vmem [thread:$0]  %s525_s1, 1024, %s33_s9, [#allocation8], %s438_s0, %s438_s0, %s439_s18  }
  0x27   :  { %428 = dma.done.wait [#allocation5], 128  }
  0x28   :  { %429 = vsyncadd [#allocation5], 4294967168 }
  0x29   :  { %430 = dma.done.wait [#allocation8], 1024  }
  0x2a   :  { %431 = vsyncadd [#allocation8], 4294966272  ;;  %vm56_vm0 = vcmask 254976   ;;  %v440_v1 = vmov 0   ;;  %v441_v2 = vmov 0.0   ;;  %v329_v11 = vld [vmem:[#allocation4] sm:$0xff]   ;;  %v102_v34 = vlaneseq }
  0x2b   :  { %197 = vmatprep.mubr.bf16.mxu0 %v440_v1  ;;  %238 = vmatprep.mubr.bf16.mxu1 %v440_v1  ;;  %57 = vst.msk [vmem:[#allocation2] sm:$0x3] %vm56_vm0, %v441_v2  ;;  %v342_v3 = vld [vmem:[#allocation7 + $0x4] ss:$16 sps:$4 sm:$0xff]   ;;  %v344_v4 = vld [vmem:[#allocation7 + $0xc] ss:$16 sps:$4 sm:$0xff]   ;;  %v330_v12 = vunpack.c.l.bf16 %v329_v11  ;;  %v331_v13 = vunpack.c.h.bf16 %v329_v11 }
  0x2c   :  { %341 = vset.pattern.permute.xlu0 %v440_v1  ;;  %165 = vmatprep.subr.bf16.mxu0 %v342_v3  ;;  %v346_v5 = vld [vmem:[#allocation7] ss:$16 sps:$4 sm:$0xff]   ;;  %v347_v6 = vld [vmem:[#allocation7 + $0x8] ss:$16 sps:$4 sm:$0xff]   ;;  %v348_v7 = vld [vmem:[#allocation7 + $0x24] ss:$16 sps:$4 sm:$0xff]  }
  0x2d   :  { %206 = vmatprep.subr.bf16.mxu1 %v344_v4  ;;  %166 = vmatpush1.bf16.msra.mxu0 %v346_v5  ;;  %v350_v8 = vld [vmem:[#allocation7 + $0x2c] ss:$16 sps:$4 sm:$0xff]   ;;  %v352_v9 = vld [vmem:[#allocation7 + $0x20] ss:$16 sps:$4 sm:$0xff]   ;;  %v353_v10 = vld [vmem:[#allocation7 + $0x28] ss:$16 sps:$4 sm:$0xff]  }
  0x2e   :  { %207 = vmatpush1.bf16.msra.mxu1 %v347_v6  ;;  %167 = vmatprep.subr.bf16.mxu0 %v348_v7  ;;  %vm63_vm1 = vcmask 261120   ;;  %vm80_vm2 = vcmask 1041409   ;;  %v103_v35 = vshrl.u32 %v102_v34, 7  ;;  %v100_v38 = vld [vmem:[%s526_s2] sm:$0xf]  ;;  %vm277_vm3 = vcmask 1041408  }
  0x2f   :  { %208 = vmatprep.subr.bf16.mxu1 %v350_v8  ;;  %v64_v14 = vsel %vm63_vm1, %v330_v12, 0.0  ;;  %v71_v15 = vsel %vm63_vm1, %v331_v13, 0.0  ;;  %v251_v57 = vld [vmem:[%s527_s3] sm:$0xf]  ;;  %s442_s3 = smov [#allocation9]  }
  0x30   :  { %v65_v16 = vrot.slane %v64_v14, 4  ;;  %v72_v17 = vrot.slane %v71_v15, 4  ;;  %v104_v36 = vsub.s32 0, %v103_v35  ;;  %v112_v37 = vsub.s32 2, %v103_v35  ;;  %v327_v13 = vld [vmem:[#allocation3] ss:$0 sm:$0xff] }
  0x31   :  { %168 = vmatpush1.bf16.msra.mxu0 %v352_v9  ;;  %v108_v39 = vsub.s32 1, %v103_v35  ;;  %v116_v40 = vsub.s32 3, %v103_v35  ;;  %s307_s23 = sshll.u32 %s442_s3, 4  ;;  %s308_s23 = int_to_ptr.vmem [resolvable:$true] %s307_s23 }
  0x32   :  { %209 = vmatpush1.bf16.msra.mxu1 %v353_v10  ;;  %v66_v18 = vadd.f32 %v65_v16, %v64_v14  ;;  %v73_v19 = vadd.f32 %v72_v17, %v71_v15  ;;  %v62_v26 = vld [vmem:[#allocation2] sm:$0x3]  ;;  %v105_v41 = vrot.slane %v100_v38, %v104_v36  ;;  %v113_v42 = vrot.slane %v100_v38, %v112_v37  ;;  %s406_s24 = scalar_lea.vmem %s308_s23, 32  ;;  %p411_p3 = scmp.lt.s32.totalorder %s308_s23, %s308_s23 }
  0x33   :  { %v109_v43 = vrot.slane %v100_v38, %v108_v39  ;;  %v117_v44 = vrot.slane %v100_v38, %v116_v40  ;;  %v256_v58 = vrot.slane %v251_v57, %v104_v36  ;;  %v264_v59 = vrot.slane %v251_v57, %v112_v37  ;;  %p407_p2 = scmp.ne.s32.totalorder %s308_s23, %s406_s24  ;;  %p412_p4 = scmp.lt.s32.totalorder %s406_s24, %s406_s24 }
  0x34   :  { %v67_v20 = vrot.slane %v66_v18, 2  ;;  %v74_v21 = vrot.slane %v73_v19, 2  ;;  %v260_v60 = vrot.slane %v251_v57, %v108_v39  ;;  %v268_v63 = vrot.slane %v251_v57, %v116_v40 }
  0x35   :  { %p413_p5 = por %p412_p4, %p411_p3 }
  0x36   :  { %v68_v22 = vadd.f32 %v67_v20, %v66_v18  ;;  %v75_v23 = vadd.f32 %v74_v21, %v73_v19 }
  0x37   :  { %p414_p6 = pnand %p413_p5, %p407_p2 }
  0x38   :  { %v69_v24 = vrot.slane %v68_v22, 1  ;;  %v76_v25 = vrot.slane %v75_v23, 1 }
  0x3a   :  { %v70_v27 = vadd.f32 %v69_v24, %v68_v22  ;;  %v77_v28 = vadd.f32 %v76_v25, %v75_v23 }
  0x3c   :  { %v81_v29 = vsel %vm80_vm2, %v77_v28, %v70_v27 }
  0x3d   :  { %v83_v30 = vadd.f32 %v81_v29, %v62_v26 }
  0x3f   :  { %85 = vst.msk [vmem:[#allocation2] sm:$0x3] %vm56_vm0, %v83_v30 }
  0x46   :  { %v89_v31 = vld [vmem:[#allocation2] sm:$0x3] }
  0x47   :  { %v90_v32 = vmul.f32 0.125, %v89_v31 }
  0x49   :  { %v91_v33 = vpack.c.bf16 %v90_v32, %v90_v32 }
  0x4b   :  { %325 = vmatmul.mubr.msk.bf16.vlgmr.msra.gmra.mrb[0].mxu0 %vm63_vm1, %v91_v33  ;;  %326 = vmatmul.mubr.msk.bf16.vlgmr.msra.gmra.mrb[0].mxu1 %vm63_vm1, %v91_v33 }
 0x11e   :  { %v199_v45 = vpop.f32.mrb[0].mxu0  ;;  %v240_v46 = vpop.f32.mrb[0].mxu1 }
 0x11f   :  { %v200_v47 = vadd.f32 %v199_v45, %v105_v41  ;;  %v241_v48 = vadd.f32 %v240_v46, %v113_v42  ;;  %v201_v49 = vpop.f32.mrb[1].mxu0  ;;  %v242_v50 = vpop.f32.mrb[1].mxu1 }
 0x120   :  { %v202_v51 = vadd.f32 %v201_v49, %v109_v43  ;;  %v243_v52 = vadd.f32 %v242_v50, %v117_v44  ;;  %v203_v53 = vpop.f32.mrb[2].mxu0  ;;  %v244_v54 = vpop.f32.mrb[2].mxu1 }
 0x121   :  { %354 = vtanh.f32 %v200_v47  ;;  %v204_v55 = vpop.f32.mrb[3].mxu0  ;;  %v245_v56 = vpop.f32.mrb[3].mxu1 }
 0x122   :  { %356 = vtanh.f32 %v241_v48 }
 0x123   :  { %358 = vtanh.f32 %v202_v51 }
 0x124   :  { %360 = vtanh.f32 %v243_v52 }
 0x12b   :  { %v355_v61 = vpop.eup %354 }
 0x12c   :  { %v357_v62 = vpop.eup %356  ;;  %v273_v0 = vmul.f32 %v355_v61, %v256_v58 }
 0x12d   :  { %v359_v1 = vpop.eup %358  ;;  %v275_v2 = vmul.f32 %v357_v62, %v264_v59 }
 0x12e   :  { %v361_v3 = vpop.eup %360  ;;  %v274_v4 = vmul.f32 %v359_v1, %v260_v60  ;;  %v278_v5 = vsel %vm277_vm3, %v273_v0, 0.0 }
 0x12f   :  { %v276_v6 = vmul.f32 %v361_v3, %v268_v63  ;;  %v281_v8 = vsel %vm277_vm3, %v275_v2, 0.0 }
 0x130   :  { %v279_v7 = vsel %vm277_vm3, %v274_v4, 0.0 }
 0x131   :  { %v280_v9 = vadd.f32 %v279_v7, %v278_v5  ;;  %v283_v11 = vsel %vm277_vm3, %v276_v6, 0.0 }
 0x133   :  { %v282_v10 = vadd.f32 %v281_v8, %v280_v9 }
 0x135   :  { %v284_v12 = vadd.f32 %v283_v11, %v282_v10 }
 0x137   :  { %285 = vadd.xlane.f32.xlu0 %v284_v12 }
 0x1c4   :  { %v286_v14 = vpop.xlane.xlu0 %285 }
 0x1c5   :  { %v294_v15 = vadd.f32 %v327_v13, %v286_v14 }
 0x1c7   :  { %297 = vperm.xlu0 %341, %v294_v15  }
 0x246   :  { %v298_v16 = vpop.permute.xlu0 %297 }
 0x247   :  { %300 = vst [vmem:[#allocation9] sm:$0x3] %v298_v16 }
 0x248   :  { %417 = shalt.err (!%p414_p6)
}
 0x249   :  { %s418_s27 = scalar_lea.hbm %s529_s5, 32 }
 0x24a   :  { %p419_p7 = scmp.ne.s32.totalorder %s529_s5, %s418_s27  ;;  %p422_p8 = scmp.lt.u32.totalorder %s418_s27, %s529_s5 }
 0x24c   :  { %p424_p9 = pnand %p422_p8, %p419_p7 }
 0x24e   :  { %427 = shalt.err (!%p424_p9)
}
 0x24f   :  { %310 = dma.vmem_to_hbm [thread:$0]  %s308_s23, 32, %s529_s5, [#allocation6]  }
 0x250   :  { %432 = dma.done.wait [#allocation6], 32  }
 0x251   :  { %433 = vsyncadd [#allocation6], 4294967264 }
 0x252   :  { %314 = vsyncpa [#allocation5], 1 }
 0x253   :  { %315 = vsyncpa [#allocation8], 1 }
 0x254   :  { %316 = vsyncpa [#allocation6], 1 }

</bundles_post_ra>
